<compile_context>
chip_gen: v6e
topology: v6e:2x2x1
jax: 0.10.0
libtpu: 0.0.40
codegen_flags: <defaults>
</compile_context>

<pallas_src>
import functools

import jax
import jax.numpy as jnp
from jax.experimental import pallas as pl
from jax.experimental.pallas import tpu as pltpu


def _patch_merging_kernel(x_ref, gb_ref, w_ref, o_ref, *, eps):
    """Fused 2x2 merge -> LayerNorm(4C) -> Linear(4C -> 2Cout, no bias).

    x_ref : (tile_r, 2, W2p, 2C)   both H rows of each merge window, contiguous
    gb_ref: (4, 2C)                rows = [g(p1=0), b(p1=0), g(p1=1), b(p1=1)]
    w_ref : (2, 2C, 2Cout)         permuted reduction-weight halves (p1=0, p1=1)
    o_ref : (tile_r*W2p, 2Cout)    token-flattened output block
    """
    tile_r, _, w2p, c2 = x_ref.shape
    n_tok = tile_r * w2p
    inv_feat = 1.0 / (2.0 * c2)                       # 1 / (4*C)

    g0 = gb_ref[0:1, :].astype(jnp.float32)
    b0 = gb_ref[1:2, :].astype(jnp.float32)
    g1 = gb_ref[2:3, :].astype(jnp.float32)
    b1 = gb_ref[3:4, :].astype(jnp.float32)
    w0 = w_ref[0]                                     # (2C, 2Cout), native dtype
    w1 = w_ref[1]

    # Each half: (tile_r, W2p, 2C) -> f32 -> (tile_r*W2p, 2C).  W2p % 8 == 0 is
    # guaranteed by the wrapper, so the flatten is a layout-free collapse.
    a0 = x_ref[:, 0, :, :].astype(jnp.float32).reshape(n_tok, c2)
    a1 = x_ref[:, 1, :, :].astype(jnp.float32).reshape(n_tok, c2)

    # Single-pass LayerNorm statistics over the virtually concatenated 4C feats.
    s = jnp.sum(a0, axis=-1, keepdims=True) + jnp.sum(a1, axis=-1, keepdims=True)
    ss = (jnp.sum(a0 * a0, axis=-1, keepdims=True)
          + jnp.sum(a1 * a1, axis=-1, keepdims=True))
    mean = s * inv_feat
    var = jnp.maximum(ss * inv_feat - mean * mean, 0.0)
    rstd = jax.lax.rsqrt(var + eps)

    n0 = (a0 - mean) * rstd * g0 + b0
    n1 = (a1 - mean) * rstd * g1 + b1

    # y = concat(n0, n1) @ [w0; w1]  ==  n0 @ w0 + n1 @ w1   (f32 accumulation).
    y = jnp.dot(n0.astype(w0.dtype), w0, preferred_element_type=jnp.float32)
    y = y + jnp.dot(n1.astype(w1.dtype), w1, preferred_element_type=jnp.float32)
    o_ref[...] = y.astype(o_ref.dtype)


def _largest_divisor_leq(n, cap):
    cap = max(1, min(n, cap))
    for d in range(cap, 0, -1):
        if n % d == 0:
            return d
    return 1


def _round_up(n, m):
    return ((n + m - 1) // m) * m


def patch_merging_forward(x, ln_weight, ln_bias, red_weight, *, eps=1e-5,
                          max_tokens_per_tile=8192, min_grid_steps=8,
                          weight_dtype=None):
    """PatchMerging forward: 2x2 merge -> LayerNorm(4C) -> Linear(4C, 2Cout).

    Args:
      x:            (B, D, H, W, C) input feature.
      ln_weight:    (4*C,) LayerNorm gamma.
      ln_bias:      (4*C,) LayerNorm beta.
      red_weight:   (2*C, 4*C) reduction weight, PyTorch (out, in) layout.
      weight_dtype: optional dtype to cast the reduction weight to (e.g. pass
                    jnp.bfloat16 to force the bf16 MXU on v5e/v6e/v7x).

    Returns:
      (B, D, ceil(H/2), ceil(W/2), 2*C) array with x's dtype.
    """
    B, D, H, W, C = x.shape
    f_part = 2 * C
    f_in = 4 * C
    f_out = red_weight.shape[0]
    assert ln_weight.shape == (f_in,) and ln_bias.shape == (f_in,)
    assert red_weight.shape == (f_out, f_in)

    H2 = (H + 1) // 2
    W2 = (W + 1) // 2
    # Sublane-align the merged width so the in-kernel token flatten is free and
    # the reduction is always one big MXU matmul (padded tokens are discarded).
    W2p = _round_up(W2, 8)
    pad_h = 2 * H2 - H
    pad_w = 2 * W2p - W
    if pad_h or pad_w:
        # TODO(synk): odd-H/W and W2 sublane-alignment zero-padding stays a
        # host-side jnp.pad (one extra copy on those shapes only).
        x = jnp.pad(x, ((0, 0), (0, 0), (0, pad_h), (0, pad_w), (0, 0)))

    R = B * D * H2
    x4 = x.reshape(R, 2, W2p, f_part)          # zero-copy contiguous view

    # Permute parameters once so the kernel's per-H-row feature order (p2, c)
    # matches the canonical rearrange order f = p2*2C + p1*C + c.
    g = ln_weight.reshape(2, 2, C)             # [p2, p1, c]
    b = ln_bias.reshape(2, 2, C)
    gb = jnp.stack([g[:, 0, :].reshape(f_part), b[:, 0, :].reshape(f_part),
                    g[:, 1, :].reshape(f_part), b[:, 1, :].reshape(f_part)],
                   axis=0)                     # (4, 2C)
    if weight_dtype is not None:
        red_weight = red_weight.astype(weight_dtype)
    w_t = red_weight.T.reshape(2, 2, C, f_out)  # [p2, p1, c, out]
    w_halves = jnp.stack([w_t[:, 0].reshape(f_part, f_out),
                          w_t[:, 1].reshape(f_part, f_out)], axis=0)  # (2,2C,2Cout)

    xb = jnp.dtype(x.dtype).itemsize
    wb = jnp.dtype(w_halves.dtype).itemsize
    gbb = jnp.dtype(gb.dtype).itemsize

    # Generation-aware VMEM budgeting (v7x has only 64 MiB per TensorCore).
    try:
        vmem_cap = int(pltpu.get_tpu_info().vmem_capacity_bytes)
    except Exception:
        vmem_cap = 64 * 1024 * 1024
    vmem_limit = max(32 << 20, min(int(0.72 * vmem_cap), 96 << 20))

    # Row-tile selection: largest divisor of R whose double-buffered I/O blocks
    # + f32 intermediates fit the budget, capped by a token-tile target and a
    # minimum grid-step count (pipelining + v7x megacore load balance).
    row_in = 2 * W2p * f_part * xb
    row_out = W2p * f_out * xb
    row_tmp = W2p * f_in * 4 * 3                   # f32 intermediates (approx)
    row_resident = 2 * (row_in + row_out) + row_tmp
    fixed = 2 * (gb.size * gbb + w_halves.size * wb)
    budget = max(vmem_limit - fixed - (4 << 20), 4 << 20)
    cap = int(budget // row_resident)
    cap = min(cap, max(1, max_tokens_per_tile // W2p))
    cap = min(cap, max(1, R // min_grid_steps))
    tile_r = _largest_divisor_leq(R, max(1, cap))
    grid = (R // tile_r,)

    n_tok = R * W2p
    cost = pl.CostEstimate(
        flops=int(2 * n_tok * f_in * f_out + 10 * n_tok * f_in),
        transcendentals=int(n_tok),
        bytes_accessed=int(n_tok * (2 * f_part + f_out) * xb
                           + w_halves.size * wb + gb.size * gbb),
    )

    kernel = functools.partial(_patch_merging_kernel, eps=eps)

    out2d = pl.pallas_call(
        kernel,
        out_shape=jax.ShapeDtypeStruct((R * W2p, f_out), x.dtype),
        grid_spec=pltpu.PrefetchScalarGridSpec(
            num_scalar_prefetch=0,
            grid=grid,
            in_specs=[
                pl.BlockSpec((tile_r, 2, W2p, f_part), lambda i: (i, 0, 0, 0)),
                pl.BlockSpec((4, f_part), lambda i: (0, 0)),
                pl.BlockSpec((2, f_part, f_out), lambda i: (0, 0, 0)),
            ],
            out_specs=pl.BlockSpec((tile_r * W2p, f_out), lambda i: (i, 0)),
        ),
        compiler_params=pltpu.CompilerParams(
            dimension_semantics=("parallel",),
            vmem_limit_bytes=vmem_limit,
        ),
        cost_estimate=cost,
    )(x4, gb, w_halves)

    out = out2d.reshape(R, W2p, f_out)
    if W2p != W2:
        out = out[:, :W2, :]                   # drop width-alignment padding
    return out.reshape(B, D, H2, W2, f_out)    # zero-copy back to 5D


def _reference(x, ln_weight, ln_bias, red_weight, eps=1e-5):
    """Pure-JAX f32 reference of the PyTorch forward."""
    x = x.astype(jnp.float32)
    ln_weight = ln_weight.astype(jnp.float32)
    ln_bias = ln_bias.astype(jnp.float32)
    red_weight = red_weight.astype(jnp.float32)
    B, D, H, W, C = x.shape
    x = jnp.pad(x, ((0, 0), (0, 0), (0, H % 2), (0, W % 2), (0, 0)))
    Hp, Wp = x.shape[2], x.shape[3]
    xr = x.reshape(B, D, Hp // 2, 2, Wp // 2, 2, C)
    xr = xr.transpose(0, 1, 2, 4, 5, 3, 6).reshape(B, D, Hp // 2, Wp // 2, 4 * C)
    mean = jnp.mean(xr, axis=-1, keepdims=True)
    var = jnp.mean((xr - mean) ** 2, axis=-1, keepdims=True)
    xn = (xr - mean) / jnp.sqrt(var + eps)
    xn = xn * ln_weight + ln_bias
    return xn @ red_weight.T


if __name__ == "__main__":
    key = jax.random.PRNGKey(0)

    def make_inputs(k, B, D, H, W, C, dtype):
        k1, k2, k3, k4 = jax.random.split(k, 4)
        x = jax.random.normal(k1, (B, D, H, W, C), jnp.float32)
        g = 1.0 + 0.05 * jax.random.normal(k2, (4 * C,), jnp.float32)
        b = 0.05 * jax.random.normal(k3, (4 * C,), jnp.float32)
        w = 0.1 * jax.random.normal(k4, (2 * C, 4 * C), jnp.float32)
        return tuple(a.astype(dtype) for a in (x, g, b, w))

    # (B, D, H, W, C, dtype, atol)
    configs = [
        (2, 2, 16, 16, 16, jnp.float32, 1e-4),   # even dims, W2 % 8 == 0
        (1, 2, 7, 9, 16, jnp.float32, 1e-4),     # odd H/W, W2=5 -> width-pad path
        (1, 1, 16, 16, 32, jnp.bfloat16, 1e-1),  # bf16 operands -> bf16 MXU
    ]

    for (B, D, H, W, C, dtype, atol) in configs:
        key, sub = jax.random.split(key)
        x, g, b, w = make_inputs(sub, B, D, H, W, C, dtype)

        out = jax.block_until_ready(patch_merging_forward(x, g, b, w))
        ref = _reference(x, g, b, w)

        expected_shape = (B, D, (H + 1) // 2, (W + 1) // 2, 2 * C)
        assert out.shape == expected_shape, (out.shape, expected_shape)
        err = float(jnp.max(jnp.abs(out.astype(jnp.float32) - ref)))
        assert err <= atol, (str(dtype), err)

    print("KERNEL_OK")
</pallas_src>

<mosaic_0001>
module attributes {stable_mosaic.version = 11 : i64} {
  func.func @_patch_merging_kernel(%arg0: i32, %arg1: memref<4x2x8x32xf32, #tpu.memory_space<vmem>>, %arg2: memref<4x32xf32, #tpu.memory_space<vmem>>, %arg3: memref<2x32x32xf32, #tpu.memory_space<vmem>>, %arg4: memref<32x32xf32, #tpu.memory_space<vmem>>) attributes {dimension_semantics = [#tpu.dimension_semantics<parallel>], iteration_bounds = array<i64: 8>, scalar_prefetch = 0 : i64, scratch_operands = 0 : i64, tpu.core_type = #tpu.core_type<tc>, window_params = [{transform_indices = @transform_0, window_bounds = array<i64: 4, 2, 8, 32>}, {pipeline_mode = #tpu.pipeline_mode<synchronous>, transform_indices = @transform_1, window_bounds = array<i64: 4, 32>}, {pipeline_mode = #tpu.pipeline_mode<synchronous>, transform_indices = @transform_2, window_bounds = array<i64: 2, 32, 32>}, {transform_indices = @transform_3, window_bounds = array<i64: 32, 32>}]} {
    %c0 = arith.constant 0 : index
    %c0_0 = arith.constant 0 : index
    %0 = vector.load %arg2[%c0, %c0_0] : memref<4x32xf32, #tpu.memory_space<vmem>>, vector<1x32xf32>
    %c1 = arith.constant 1 : index
    %c0_1 = arith.constant 0 : index
    %1 = vector.load %arg2[%c1, %c0_1] : memref<4x32xf32, #tpu.memory_space<vmem>>, vector<1x32xf32>
    %c2 = arith.constant 2 : index
    %c0_2 = arith.constant 0 : index
    %2 = vector.load %arg2[%c2, %c0_2] : memref<4x32xf32, #tpu.memory_space<vmem>>, vector<1x32xf32>
    %c3 = arith.constant 3 : index
    %c0_3 = arith.constant 0 : index
    %3 = vector.load %arg2[%c3, %c0_3] : memref<4x32xf32, #tpu.memory_space<vmem>>, vector<1x32xf32>
    %c0_4 = arith.constant 0 : index
    %c0_5 = arith.constant 0 : index
    %c0_6 = arith.constant 0 : index
    %4 = vector.load %arg3[%c0_4, %c0_5, %c0_6] : memref<2x32x32xf32, #tpu.memory_space<vmem>>, vector<1x32x32xf32>
    %5 = vector.shape_cast %4 : vector<1x32x32xf32> to vector<32x32xf32>
    %c1_7 = arith.constant 1 : index
    %c0_8 = arith.constant 0 : index
    %c0_9 = arith.constant 0 : index
    %6 = vector.load %arg3[%c1_7, %c0_8, %c0_9] : memref<2x32x32xf32, #tpu.memory_space<vmem>>, vector<1x32x32xf32>
    %7 = vector.shape_cast %6 : vector<1x32x32xf32> to vector<32x32xf32>
    %c0_10 = arith.constant 0 : index
    %c0_11 = arith.constant 0 : index
    %c0_12 = arith.constant 0 : index
    %c0_13 = arith.constant 0 : index
    %8 = vector.load %arg1[%c0_10, %c0_11, %c0_12, %c0_13] : memref<4x2x8x32xf32, #tpu.memory_space<vmem>>, vector<4x1x8x32xf32>
    %9 = vector.shape_cast %8 : vector<4x1x8x32xf32> to vector<4x8x32xf32>
    %10 = vector.shape_cast %9 : vector<4x8x32xf32> to vector<32x32xf32>
    %c0_14 = arith.constant 0 : index
    %c1_15 = arith.constant 1 : index
    %c0_16 = arith.constant 0 : index
    %c0_17 = arith.constant 0 : index
    %11 = vector.load %arg1[%c0_14, %c1_15, %c0_16, %c0_17] : memref<4x2x8x32xf32, #tpu.memory_space<vmem>>, vector<4x1x8x32xf32>
    %12 = vector.shape_cast %11 : vector<4x1x8x32xf32> to vector<4x8x32xf32>
    %13 = vector.shape_cast %12 : vector<4x8x32xf32> to vector<32x32xf32>
    %cst = arith.constant dense<0.000000e+00> : vector<32xf32>
    %14 = vector.multi_reduction <add>, %10, %cst [1] : vector<32x32xf32> to vector<32xf32>
    %15 = vector.shape_cast %14 : vector<32xf32> to vector<32x1xf32>
    %cst_18 = arith.constant dense<0.000000e+00> : vector<32xf32>
    %16 = vector.multi_reduction <add>, %13, %cst_18 [1] : vector<32x32xf32> to vector<32xf32>
    %17 = vector.shape_cast %16 : vector<32xf32> to vector<32x1xf32>
    %18 = arith.addf %15, %17 : vector<32x1xf32>
    %19 = arith.mulf %10, %10 : vector<32x32xf32>
    %cst_19 = arith.constant dense<0.000000e+00> : vector<32xf32>
    %20 = vector.multi_reduction <add>, %19, %cst_19 [1] : vector<32x32xf32> to vector<32xf32>
    %21 = vector.shape_cast %20 : vector<32xf32> to vector<32x1xf32>
    %22 = arith.mulf %13, %13 : vector<32x32xf32>
    %cst_20 = arith.constant dense<0.000000e+00> : vector<32xf32>
    %23 = vector.multi_reduction <add>, %22, %cst_20 [1] : vector<32x32xf32> to vector<32xf32>
    %24 = vector.shape_cast %23 : vector<32xf32> to vector<32x1xf32>
    %25 = arith.addf %21, %24 : vector<32x1xf32>
    %cst_21 = arith.constant 1.562500e-02 : f32
    %26 = vector.broadcast %cst_21 : f32 to vector<32x1xf32>
    %27 = arith.mulf %18, %26 : vector<32x1xf32>
    %cst_22 = arith.constant 1.562500e-02 : f32
    %28 = vector.broadcast %cst_22 : f32 to vector<32x1xf32>
    %29 = arith.mulf %25, %28 : vector<32x1xf32>
    %30 = arith.mulf %27, %27 : vector<32x1xf32>
    %31 = arith.subf %29, %30 : vector<32x1xf32>
    %cst_23 = arith.constant 0.000000e+00 : f32
    %32 = vector.broadcast %cst_23 : f32 to vector<32x1xf32>
    %33 = arith.maximumf %31, %32 : vector<32x1xf32>
    %cst_24 = arith.constant 9.99999974E-6 : f32
    %34 = vector.broadcast %cst_24 : f32 to vector<32x1xf32>
    %35 = arith.addf %33, %34 : vector<32x1xf32>
    %36 = math.rsqrt %35 : vector<32x1xf32>
    %37 = vector.broadcast %27 : vector<32x1xf32> to vector<32x32xf32>
    %38 = arith.subf %10, %37 : vector<32x32xf32>
    %39 = vector.broadcast %36 : vector<32x1xf32> to vector<32x32xf32>
    %40 = arith.mulf %38, %39 : vector<32x32xf32>
    %41 = vector.broadcast %0 : vector<1x32xf32> to vector<32x32xf32>
    %42 = arith.mulf %40, %41 : vector<32x32xf32>
    %43 = vector.broadcast %1 : vector<1x32xf32> to vector<32x32xf32>
    %44 = arith.addf %42, %43 : vector<32x32xf32>
    %45 = vector.broadcast %27 : vector<32x1xf32> to vector<32x32xf32>
    %46 = arith.subf %13, %45 : vector<32x32xf32>
    %47 = vector.broadcast %36 : vector<32x1xf32> to vector<32x32xf32>
    %48 = arith.mulf %46, %47 : vector<32x32xf32>
    %49 = vector.broadcast %2 : vector<1x32xf32> to vector<32x32xf32>
    %50 = arith.mulf %48, %49 : vector<32x32xf32>
    %51 = vector.broadcast %3 : vector<1x32xf32> to vector<32x32xf32>
    %52 = arith.addf %50, %51 : vector<32x32xf32>
    %cst_25 = arith.constant dense<0.000000e+00> : vector<32x32xf32>
    %53 = tpu.matmul %44, %5, %cst_25 {dimension_numbers = #tpu.dot_dimension_numbers<[1], [0], [0], [1], [0, 0, 1, 1], [], []>} : vector<32x32xf32>, vector<32x32xf32>, vector<32x32xf32> -> vector<32x32xf32>
    %cst_26 = arith.constant dense<0.000000e+00> : vector<32x32xf32>
    %54 = tpu.matmul %52, %7, %cst_26 {dimension_numbers = #tpu.dot_dimension_numbers<[1], [0], [0], [1], [0, 0, 1, 1], [], []>} : vector<32x32xf32>, vector<32x32xf32>, vector<32x32xf32> -> vector<32x32xf32>
    %55 = arith.addf %53, %54 : vector<32x32xf32>
    %c0_27 = arith.constant 0 : index
    %c0_28 = arith.constant 0 : index
    %56 = vector.load %arg4[%c0_27, %c0_28] : memref<32x32xf32, #tpu.memory_space<vmem>>, vector<32x32xf32>
    tpu.vector_store %arg4[%c0_27, %c0_28], %55 {strides = array<i32>} : memref<32x32xf32, #tpu.memory_space<vmem>>, vector<32x32xf32>,
    return
  }
  func.func @transform_0(%arg0: i32) -> (i32, i32, i32, i32) {
    %c0_i32 = arith.constant 0 : i32
    %c0_i32_0 = arith.constant 0 : i32
    %c0_i32_1 = arith.constant 0 : i32
    %c0_i32_2 = arith.constant 0 : i32
    return %arg0, %c0_i32, %c0_i32_0, %c0_i32_1 : i32, i32, i32, i32
  }
  func.func @transform_1(%arg0: i32) -> (i32, i32) {
    %c0_i32 = arith.constant 0 : i32
    %c0_i32_0 = arith.constant 0 : i32
    %c0_i32_1 = arith.constant 0 : i32
    return %c0_i32, %c0_i32_0 : i32, i32
  }
  func.func @transform_2(%arg0: i32) -> (i32, i32, i32) {
    %c0_i32 = arith.constant 0 : i32
    %c0_i32_0 = arith.constant 0 : i32
    %c0_i32_1 = arith.constant 0 : i32
    %c0_i32_2 = arith.constant 0 : i32
    return %c0_i32, %c0_i32_0, %c0_i32_1 : i32, i32, i32
  }
  func.func @transform_3(%arg0: i32) -> (i32, i32) {
    %c0_i32 = arith.constant 0 : i32
    %c0_i32_0 = arith.constant 0 : i32
    return %arg0, %c0_i32 : i32, i32
  }
}

</mosaic_0001>

<bundles_post_ra>
// kernel: tpu_custom_call.1
= control target key start
LH: loop header
LB: loop body
LE: loop exit
PB: predicated region body
PF: predicated region fallthrough
CT: control target
= control target key end

     0   :  { %8 = vsyncpa [#allocation3], 0  ;;  %s1201_s0 = inlined_call_operand.hbm [shape: f32[32,2,8,32], index: 0, kind: input, shape index: {}]   ;;  %s1202_s1 = inlined_call_operand.hbm [shape: f32[4,32], index: 1, kind: input, shape index: {}]   ;;  %s1203_s2 = inlined_call_operand.hbm [shape: f32[2,32,32], index: 2, kind: input, shape index: {}]   ;;  %s1204_s3 = inlined_call_operand.vmem [shape: f32[256,32], index: 3, kind: output, shape index: {}]  }
   0x1   :  { %10 = vsyncpa [#allocation3 + $0x1], 0 }
   0x2   :  { %11 = vsyncpa [#allocation5], 0  ;;  %s963_s12 = smov 0   ;;  %s965_s13 = smov 0  }
   0x3   :  { %s967_s14 = smov 0   ;;  %s969_s15 = smov 0  }
   0x4 LB: > { %s668_s16 = sadd.s32 4294967295, %s936_s15   ;;  %s983_s17 = sadd.s32 1, %s936_s15   ;;  %s936_s15 = sphi %s969_s15, %s1223_s15   ;;  %s932_s14 = sphi %s967_s14, %s1222_s14   ;;  %s928_s13 = sphi %s965_s13, %s1221_s13   ;;  %s924_s12 = sphi %s963_s12, %s1220_s12  }
   0x5   : > { %s21_s18 = ssub.s32 %s936_s15, %s983_s17  ;;  %s24_s19 = sadd.s32 1, %s932_s14 }
   0x6   : > { %p22_p0 = scmp.eq.s32.totalorder %s21_s18, 0  ;;  %p31_p1 = scmp.ne.s32.totalorder %s932_s14, %s928_s13 }
   0x7   : > { %p32_p2 = scmp.eq.s32.totalorder %s936_s15, 0  ;;  %p37_p3 = scmp.ne.s32.totalorder %s928_s13, %s924_s12 }
   0x8   : > { %s993_s20 = scalar_select %p22_p0, %s932_s14, %s24_s19  }
   0x9   : > { %p995_p4 = por %p32_p2, %p31_p1  ;;  %p1001_p5 = scmp.eq.s32.totalorder %s668_s16, 0 }
   0xa   : > { %p670_p6 = scmp.ge.s32.totalorder %s936_s15, 1  ;;  %p116_p7 = scmp.lt.s32.totalorder %s936_s15, 9 }
   0xb   : > { %s1211_s22 = scalar_select %p1001_p5, 1, 0 }
   0xc   : > { %p1009_p8 = por %p1001_p5, %p37_p3  ;;  %p1013_p9 = pnand %p670_p6, %p116_p7 }
   0xd   : > { %s938_s25 = smov [#allocation4]   ;;  %p771_p11 = scmp.lt.s32.totalorder %s936_s15, 8 }
   0xe   : > { %s1212_s23 = scalar_select %p1009_p8, 1, 0 }
   0xf   : > { %s1213_s24 = scalar_select %p1013_p9, 1, 0 }
  0x10   : > { %s129_s26 = sshll.u32 %s938_s25, 4  ;;  %p758_p10 = pneg %p1013_p9  ;;  %s130_s26 = int_to_ptr.vmem [resolvable:$true] %s129_s26 }
  0x11   : > { %s939_s28 = smov [#allocation6]   ;;  %p1028_p13 = pnand %p771_p11, %p995_p4 }
  0x12   : > { %p1022_p12 = pnand %p758_p10, %p1001_p5  ;;  %s139_s29 = sshll.u32 %s939_s28, 4  ;;  %s140_s29 = int_to_ptr.vmem [resolvable:$true] %s139_s29 }
  0x13   : > { %s1215_s30 = scalar_select %p1028_p13, 1, 0 }
  0x14   : > { %p820_p0 = pneg %p1022_p12  ;;  %s829_s4 = scalar_lea.vmem %s130_s26, 64 }
  0x15   : > { %p830_p1 = scmp.ne.s32.totalorder %s130_s26, %s829_s4  ;;  %p837_p6 = scmp.lt.s32.totalorder %s130_s26, %s130_s26 }
  0x16   : > { %p838_p7 = scmp.lt.s32.totalorder %s829_s4, %s829_s4 }
  0x17   : > { %p832_p2 = pnand %p830_p1, %p820_p0 }
  0x18   : > { %p839_p10 = por %p838_p7, %p837_p6 }
  0x19   : > { %p833_p3 = pneg %p832_p2 }
  0x1b   : > { %p840_p5 = pnand %p839_p10, %p833_p3 }
  0x1d   : > { %843 = shalt.err (!%p840_p5)
}
  0x1e   : > { %761 = dma.hbm_to_vmem [thread:$0]  (!%p1022_p12), %s1202_s1, 64, %s130_s26, [#allocation5]  }
  0x1f   : > { %s855_s7 = scalar_lea.vmem %s140_s29, 1024  ;;  %p863_p1 = scmp.lt.s32.totalorder %s140_s29, %s140_s29 }
  0x20   : > { %p856_p4 = scmp.ne.s32.totalorder %s140_s29, %s855_s7  ;;  %p864_p2 = scmp.lt.s32.totalorder %s855_s7, %s855_s7 }
  0x22   : > { %p858_p11 = pnand %p856_p4, %p820_p0  ;;  %p865_p9 = por %p864_p2, %p863_p1 }
  0x24   : > { %p859_p8 = pneg %p858_p11 }
  0x26   : > { %p866_p13 = pnand %p865_p9, %p859_p8 }
  0x28   : > { %869 = shalt.err (!%p866_p13)
}
  0x29   : > { %s940_s8 = smov 128   ;;  %s941_s9 = smov 8  }
  0x2a   : > { %764 = dma.hbm_to_vmem [thread:$0]  (!%p1022_p12), %s1203_s2, 1024, %s140_s29, [#allocation5], %s940_s8, %s940_s8, %s941_s9  }
  0x2b   : > { %s153_s12 = sand.u32 1, %s932_s14   ;;  %s703_s18 = sshll.u32 %s936_s15, 10 }
  0x2c   : > { %s674_s19 = sshll.u32 %s153_s12, 6  ;;  %s1058_s26 = scalar_lea.hbm %s1201_s0, %s703_s18 }
  0x2d   : > { %s157_s28 = scalar_lea.vmem [#allocation2], %s674_s19  ;;  %s1062_s4 = scalar_lea.sflag [#allocation3], %s153_s12 }
  0x2e   : > { %s165_s27 = sshll.u32 %s157_s28, 4  ;;  %s870_s5 = scalar_lea.hbm %s1058_s26, 1024  ;;  %s1060_s27 = int_to_ptr.vmem [resolvable:$true] %s165_s27 }
  0x2f   : > { %p871_p5 = scmp.ne.s32.totalorder %s1058_s26, %s870_s5  ;;  %p1216_p8 = scmp.ne.s32.totalorder %s1215_s30, 0 }
  0x30   : > { %s875_s7 = scalar_lea.hbm %s1201_s0, 8192  ;;  %p876_p0 = scmp.lt.s32.totalorder %s1058_s26, %s1201_s0 }
  0x31   : > { %p872_p9 = pneg %p1216_p8  ;;  %p877_p3 = scmp.lt.s32.totalorder %s875_s7, %s870_s5 }
  0x33   : > { %p873_p12 = pnand %p872_p9, %p871_p5  ;;  %p878_p6 = por %p877_p3, %p876_p0 }
  0x35   : > { %p874_p13 = pneg %p873_p12 }
  0x37   : > { %p879_p7 = pnand %p878_p6, %p874_p13 }
  0x39   : > { %882 = shalt.err (!%p879_p7)
}
  0x3a   : > { %s883_s12 = scalar_lea.vmem %s1060_s27, 1024  ;;  %s942_s18 = smov [#allocation2]  }
  0x3b   : > { %p884_p10 = scmp.ne.s32.totalorder %s1060_s27, %s883_s12  ;;  %s888_s19 = sshll.u32 %s942_s18, 4  ;;  %s889_s19 = int_to_ptr.vmem [resolvable:$false] %s888_s19 }
  0x3c   : > { %s890_s21 = scalar_lea.vmem %s889_s19, 2048  ;;  %p891_p1 = scmp.lt.s32.totalorder %s1060_s27, %s889_s19 }
  0x3d   : > { %p886_p4 = pnand %p884_p10, %p872_p9  ;;  %p892_p2 = scmp.lt.s32.totalorder %s890_s21, %s883_s12 }
  0x3f   : > { %p887_p11 = pneg %p886_p4  ;;  %p893_p5 = por %p892_p2, %p891_p1 }
  0x41   : > { %p894_p12 = pnand %p893_p5, %p887_p11 }
  0x43   : > { %897 = shalt.err (!%p894_p12)
}
  0x44   : > { %768 = dma.hbm_to_vmem [thread:$0]  (!%p1216_p8), %s1058_s26, 1024, %s1060_s27, %s1062_s4, %s940_s8, %s940_s8, %s941_s9  }
  0x45   : > { %p1217_p9 = scmp.ne.s32.totalorder %s1213_s24, 0 }
  0x46   : > { %s179_s25 = sand.u32 (!%p1217_p9), 1, %s928_s13   ;;  %p1218_p13 = scmp.ne.s32.totalorder (!%p1217_p9), %s1212_s23, 0 }
  0x47   : > { %177 = sbr.rel (%p1217_p9) target bundleno = 476 (0x1dc), region = 32  ;;  %s679_s28 = sshll.u32 (!%p1217_p9), %s179_s25, 6 }
  0x48   : > { %s180_s5 = scalar_lea.sflag (!%p1217_p9), [#allocation3], %s179_s25  ;;  %s1089_s29 = scalar_lea.vmem (!%p1217_p9), [#allocation2], %s679_s28 }
  0x4c   : > { %915 = dma.done.wait (%p1218_p13), %s180_s5, 1024  }
  0x4d   : > { %917 = vsyncadd (%p1218_p13), %s180_s5, 4294966272  ;;  %p1219_p0 = scmp.ne.s32.totalorder %s1211_s22, 0 }
  0x4f   : > { %919 = dma.done.wait (%p1219_p0), [#allocation5], 1088  }
  0x50   : > { %921 = vsyncadd (%p1219_p0), [#allocation5], 4294966208  ;;  %vm243_vm0 = vcmask 261120   ;;  %v1100_v0 = vld [vmem:[%s1089_s29 + $0x10] sm:$0xff]  ;;  %v1103_v1 = vld [vmem:[%s1089_s29] sm:$0xff]  ;;  %s682_s22 = sshll.u32 %s668_s16, 2 }
  0x51   : > { %v1106_v2 = vld [vmem:[%s1089_s29 + $0x18] sm:$0xff]  ;;  %v247_v3 = vsel %vm243_vm0, %v1100_v0, 0.0  ;;  %v244_v4 = vsel %vm243_vm0, %v1103_v1, 0.0  ;;  %v1113_v5 = vld [vmem:[%s1089_s29 + $0x8] sm:$0xff]  ;;  %v272_v9 = vmul.f32 %v1103_v1, %v1103_v1  ;;  %v273_v13 = vmul.f32 %v1100_v0, %v1100_v0  ;;  %v1135_v17 = vld [vmem:[%s1089_s29 + $0x20] sm:$0xff]  ;;  %p216_p8 = scmp.lt.s32.totalorder %s682_s22, 31 }
  0x52   : > { %248 = vadd.xlane.f32.xlu1 %v247_v3  ;;  %245 = vadd.xlane.f32.xlu0 %v244_v4  ;;  %v259_v6 = vsel %vm243_vm0, %v1106_v2, 0.0  ;;  %v256_v7 = vsel %vm243_vm0, %v1113_v5, 0.0  ;;  %v288_v8 = vmul.f32 %v1113_v5, %v1113_v5  ;;  %v289_v12 = vmul.f32 %v1106_v2, %v1106_v2  ;;  %v1132_v16 = vld [vmem:[%s1089_s29 + $0x28] sm:$0xff]  ;;  %v1142_v20 = vld [vmem:[%s1089_s29 + $0x38] sm:$0xff]  ;;  %v1145_v21 = vld [vmem:[%s1089_s29 + $0x30] sm:$0xff] }
  0x53   : > { %v276_v11 = vsel %vm243_vm0, %v272_v9, 0.0  ;;  %v279_v15 = vsel %vm243_vm0, %v273_v13, 0.0  ;;  %v262_v18 = vsel %vm243_vm0, %v1132_v16, 0.0  ;;  %v250_v19 = vsel %vm243_vm0, %v1135_v17, 0.0  ;;  %v233_v32 = vld [vmem:[#allocation6 + $0x38] sm:$0xff]  ;;  %v232_v34 = vld [vmem:[#allocation6 + $0x30] sm:$0xff] }
  0x54   : > { %v292_v10 = vsel %vm243_vm0, %v288_v8, 0.0  ;;  %v295_v14 = vsel %vm243_vm0, %v289_v12, 0.0  ;;  %v265_v22 = vsel %vm243_vm0, %v1142_v20, 0.0  ;;  %v253_v23 = vsel %vm243_vm0, %v1145_v21, 0.0  ;;  %v228_v33 = vld [vmem:[#allocation6 + $0x18] sm:$0xff]  ;;  %720 = vmatprep.subr.mxu0 %v233_v32  ;;  %v227_v35 = vld [vmem:[#allocation6 + $0x10] sm:$0xff] }
  0x55   : > { %v290_v24 = vmul.f32 %v1132_v16, %v1132_v16  ;;  %v274_v25 = vmul.f32 %v1135_v17, %v1135_v17  ;;  %v291_v28 = vmul.f32 %v1142_v20, %v1142_v20  ;;  %v275_v29 = vmul.f32 %v1145_v21, %v1145_v21  ;;  %734 = vmatprep.subr.mxu1 %v228_v33  ;;  %v231_v36 = vld [vmem:[#allocation6 + $0x28] sm:$0xff]  ;;  %v230_v38 = vld [vmem:[#allocation6 + $0x20] sm:$0xff]  ;;  %s1225_s22 = smov (!%p216_p8, %s682_s22), 31 }
  0x56   : > { %260 = vadd.xlane.f32.xlu1 %v259_v6  ;;  %257 = vadd.xlane.f32.xlu0 %v256_v7  ;;  %v226_v37 = vld [vmem:[#allocation6 + $0x8] sm:$0xff]  ;;  %v225_v39 = vld [vmem:[#allocation6] sm:$0xff]  ;;  %s683_s23 = sshll.u32 %s1225_s22, 3 }
  0x57   : > { %v298_v26 = vsel %vm243_vm0, %v290_v24, 0.0  ;;  %v282_v27 = vsel %vm243_vm0, %v274_v25, 0.0  ;;  %v301_v30 = vsel %vm243_vm0, %v291_v28, 0.0  ;;  %v285_v31 = vsel %vm243_vm0, %v275_v29, 0.0  ;;  %721 = vmatpush3.msra.mxu0 %v233_v32  ;;  %735 = vmatpush3.msra.mxu1 %v228_v33  ;;  %v690_v33 = vld [vmem:[#allocation4 + $0x2] ss:$0 sm:$0xff]  ;;  %s219_s8 = scalar_lea.vmem %s1204_s3, %s683_s23 }
  0x58   : > { %722 = vmatprep.subr.mxu0 %v232_v34  ;;  %736 = vmatprep.subr.mxu1 %v227_v35 }
  0x59   : > { %723 = vmatpush3.msra.mxu0 %v232_v34  ;;  %737 = vmatpush3.msra.mxu1 %v227_v35  ;;  %v688_v34 = vld [vmem:[#allocation4] ss:$0 sm:$0xff] }
  0x5a   : > { %293 = vadd.xlane.f32.xlu1 %v292_v10  ;;  %277 = vadd.xlane.f32.xlu0 %v276_v11 }
  0x5b   : > { %724 = vmatprep.subr.mxu0 %v231_v36  ;;  %738 = vmatprep.subr.mxu1 %v226_v37 }
  0x5c   : > { %725 = vmatpush3.msra.mxu0 %v231_v36  ;;  %739 = vmatpush3.msra.mxu1 %v226_v37 }
  0x5d   : > { %726 = vmatprep.subr.mxu0 %v230_v38  ;;  %740 = vmatprep.subr.mxu1 %v225_v39 }
  0x5e   : > { %296 = vadd.xlane.f32.xlu1 %v295_v14  ;;  %280 = vadd.xlane.f32.xlu0 %v279_v15 }
  0x5f   : > { %727 = vmatpush3.msra.mxu0 %v230_v38  ;;  %741 = vmatpush3.msra.mxu1 %v225_v39 }
  0x62   : > { %263 = vadd.xlane.f32.xlu1 %v262_v18  ;;  %251 = vadd.xlane.f32.xlu0 %v250_v19 }
  0x66   : > { %266 = vadd.xlane.f32.xlu1 %v265_v22  ;;  %254 = vadd.xlane.f32.xlu0 %v253_v23 }
  0x6a   : > { %299 = vadd.xlane.f32.xlu1 %v298_v26  ;;  %283 = vadd.xlane.f32.xlu0 %v282_v27 }
  0x6e   : > { %302 = vadd.xlane.f32.xlu1 %v301_v30  ;;  %286 = vadd.xlane.f32.xlu0 %v285_v31 }
  0xdb   : > { %v249_v40 = vpop.xlane.xlu1 %248  ;;  %v246_v41 = vpop.xlane.xlu0 %245 }
  0xdf   : > { %v261_v42 = vpop.xlane.xlu1 %260  ;;  %v258_v43 = vpop.xlane.xlu0 %257 }
  0xe0   : > { %v268_v44 = vadd.f32 %v258_v43, %v246_v41  ;;  %v269_v45 = vadd.f32 %v261_v42, %v249_v40  ;;  %v691_v40 = vld [vmem:[#allocation4 + $0x3] ss:$0 sm:$0xff]  ;;  %v689_v41 = vld [vmem:[#allocation4 + $0x1] ss:$0 sm:$0xff] }
  0xe2   : > { %v308_v46 = vmul.f32 0.015625, %v268_v44  ;;  %v309_v50 = vmul.f32 0.015625, %v269_v45 }
  0xe3   : > { %v294_v47 = vpop.xlane.xlu1 %293  ;;  %v278_v48 = vpop.xlane.xlu0 %277 }
  0xe4   : > { %v304_v49 = vadd.f32 %v294_v47, %v278_v48  ;;  %v316_v51 = vmul.f32 %v308_v46, %v308_v46  ;;  %v317_v57 = vmul.f32 %v309_v50, %v309_v50  ;;  %v336_v28 = vsub.f32 %v1103_v1, %v308_v46 }
  0xe5   : > { %v360_v29 = vsub.f32 %v1113_v5, %v308_v46  ;;  %v337_v37 = vsub.f32 %v1100_v0, %v309_v50  ;;  %v361_v38 = vsub.f32 %v1106_v2, %v309_v50 }
  0xe6   : > { %v312_v52 = vmul.f32 0.015625, %v304_v49 }
  0xe7   : > { %v297_v53 = vpop.xlane.xlu1 %296  ;;  %v281_v54 = vpop.xlane.xlu0 %280 }
  0xe8   : > { %v305_v55 = vadd.f32 %v297_v53, %v281_v54  ;;  %v320_v56 = vsub.f32 %v312_v52, %v316_v51 }
  0xea   : > { %v313_v58 = vmul.f32 0.015625, %v305_v55  ;;  %v324_v59 = vmax.f32 %v320_v56, 0.0 }
  0xeb   : > { %v264_v60 = vpop.xlane.xlu1 %263  ;;  %v252_v61 = vpop.xlane.xlu0 %251 }
  0xec   : > { %v321_v62 = vsub.f32 %v313_v58, %v317_v57  ;;  %v328_v63 = vadd.f32 1e-05, %v324_v59  ;;  %v270_v4 = vadd.f32 %v264_v60, %v252_v61 }
  0xee   : > { %v325_v3 = vmax.f32 %v321_v62, 0.0  ;;  %810 = vrsqrt.f32 %v328_v63  ;;  %v310_v9 = vmul.f32 0.015625, %v270_v4 }
  0xef   : > { %v267_v6 = vpop.xlane.xlu1 %266  ;;  %v255_v7 = vpop.xlane.xlu0 %254 }
  0xf0   : > { %v329_v8 = vadd.f32 1e-05, %v325_v3  ;;  %v271_v10 = vadd.f32 %v267_v6, %v255_v7  ;;  %v318_v15 = vmul.f32 %v310_v9, %v310_v9  ;;  %v338_v50 = vsub.f32 %v1135_v17, %v310_v9 }
  0xf1   : > { %v362_v51 = vsub.f32 %v1132_v16, %v310_v9 }
  0xf2   : > { %812 = vrsqrt.f32 %v329_v8  ;;  %v311_v14 = vmul.f32 0.015625, %v271_v10 }
  0xf3   : > { %v300_v11 = vpop.xlane.xlu1 %299  ;;  %v284_v12 = vpop.xlane.xlu0 %283 }
  0xf4   : > { %v306_v13 = vadd.f32 %v300_v11, %v284_v12  ;;  %v319_v26 = vmul.f32 %v311_v14, %v311_v14  ;;  %v339_v55 = vsub.f32 %v1145_v21, %v311_v14  ;;  %v363_v56 = vsub.f32 %v1142_v20, %v311_v14 }
  0xf6   : > { %v314_v18 = vmul.f32 0.015625, %v306_v13 }
  0xf7   : > { %v303_v19 = vpop.xlane.xlu1 %302  ;;  %v287_v22 = vpop.xlane.xlu0 %286 }
  0xf8   : > { %v322_v23 = vsub.f32 %v314_v18, %v318_v15  ;;  %v307_v24 = vadd.f32 %v303_v19, %v287_v22 }
  0xfa   : > { %v326_v25 = vmax.f32 %v322_v23, 0.0  ;;  %v315_v27 = vmul.f32 0.015625, %v307_v24 }
  0xfb   : > { %v811_v30 = vpop.eup %810 }
  0xfc   : > { %v330_v31 = vadd.f32 1e-05, %v326_v25  ;;  %v323_v32 = vsub.f32 %v315_v27, %v319_v26  ;;  %v364_v35 = vmul.f32 %v811_v30, %v360_v29  ;;  %v340_v36 = vmul.f32 %v811_v30, %v336_v28 }
  0xfe   : > { %814 = vrsqrt.f32 %v330_v31  ;;  %v327_v39 = vmax.f32 %v323_v32, 0.0  ;;  %v372_v43 = vmul.f32 %v690_v33, %v364_v35  ;;  %v348_v1 = vmul.f32 %v688_v34, %v340_v36 }
  0xff   : > { %v813_v42 = vpop.eup %812 }
 0x100   : > { %v331_v44 = vadd.f32 1e-05, %v327_v39  ;;  %v365_v5 = vmul.f32 %v813_v42, %v361_v38  ;;  %v341_v45 = vmul.f32 %v813_v42, %v337_v37  ;;  %v380_v46 = vadd.f32 %v691_v40, %v372_v43 }
 0x101   : > { %v356_v47 = vadd.f32 %v689_v41, %v348_v1 }
 0x102   : > { %816 = vrsqrt.f32 %v331_v44  ;;  %v373_v48 = vmul.f32 %v690_v33, %v365_v5  ;;  %v349_v49 = vmul.f32 %v688_v34, %v341_v45  ;;  %728 = vmatprep.mubr.msk.f32.mxu0 %vm243_vm0, %v380_v46 }
 0x103   : > { %742 = vmatprep.mubr.msk.f32.mxu1 %vm243_vm0, %v356_v47 }
 0x104   : > { %v381_v0 = vadd.f32 %v691_v40, %v373_v48  ;;  %v357_v2 = vadd.f32 %v689_v41, %v349_v49 }
 0x106   : > { %729 = vmatmul.mubr.msk.f32.vlgmr.msra.gmra.mxu0 %vm243_vm0, %v381_v0  ;;  %743 = vmatmul.mubr.msk.f32.vlgmr.msra.gmra.mxu1 %vm243_vm0, %v357_v2 }
 0x10b   : > { %v815_v52 = vpop.eup %814 }
 0x10c   : > { %v366_v53 = vmul.f32 %v815_v52, %v362_v51  ;;  %v342_v54 = vmul.f32 %v815_v52, %v338_v50 }
 0x10e   : > { %v374_v57 = vmul.f32 %v690_v33, %v366_v53  ;;  %v350_v58 = vmul.f32 %v688_v34, %v342_v54 }
 0x10f   : > { %v817_v59 = vpop.eup %816 }
 0x110   : > { %v382_v60 = vadd.f32 %v691_v40, %v374_v57  ;;  %v358_v61 = vadd.f32 %v689_v41, %v350_v58  ;;  %v367_v62 = vmul.f32 %v817_v59, %v363_v56  ;;  %v343_v63 = vmul.f32 %v817_v59, %v339_v55 }
 0x112   : > { %731 = vmatprep.mubr.msk.f32.mxu0 %vm243_vm0, %v382_v60  ;;  %745 = vmatprep.mubr.msk.f32.mxu1 %vm243_vm0, %v358_v61  ;;  %v375_v16 = vmul.f32 %v690_v33, %v367_v62  ;;  %v351_v17 = vmul.f32 %v688_v34, %v343_v63 }
 0x114   : > { %v383_v3 = vadd.f32 %v691_v40, %v375_v16  ;;  %v359_v4 = vadd.f32 %v689_v41, %v351_v17 }
 0x116   : > { %732 = vmatmul.mubr.msk.f32.gmra.mxu0 %vm243_vm0, %v383_v3  ;;  %746 = vmatmul.mubr.msk.f32.gmra.mxu1 %vm243_vm0, %v359_v4 }
 0x1c6   : > { %v730_v20 = vpop.f32.mrf.mxu0  ;;  %v744_v21 = vpop.f32.mrf.mxu1 }
 0x1c7   : > { %v565_v6 = vadd.f32 %v744_v21, %v730_v20 }
 0x1c8   : > { %v462_v7 = vpop.f32.mrf.mxu0  ;;  %v559_v8 = vpop.f32.mrf.mxu1 }
 0x1c9   : > { %579 = vst.msk [vmem:[%s219_s8 + $0x8] sm:$0xff] %vm243_vm0, %v565_v6  ;;  %v560_v9 = vadd.f32 %v559_v8, %v462_v7 }
 0x1cb   : > { %578 = vst.msk [vmem:[%s219_s8] sm:$0xff] %vm243_vm0, %v560_v9 }
 0x1d6   : > { %v733_v10 = vpop.f32.mrf.mxu0  ;;  %v747_v11 = vpop.f32.mrf.mxu1 }
 0x1d7   : > { %v575_v12 = vadd.f32 %v747_v11, %v733_v10 }
 0x1d8   : > { %v472_v13 = vpop.f32.mrf.mxu0  ;;  %v569_v14 = vpop.f32.mrf.mxu1 }
 0x1d9   : > { %581 = vst.msk [vmem:[%s219_s8 + $0x18] sm:$0xff] %vm243_vm0, %v575_v12  ;;  %v570_v15 = vadd.f32 %v569_v14, %v472_v13 }
 0x1db   : > { %580 = vst.msk [vmem:[%s219_s8 + $0x10] sm:$0xff] %vm243_vm0, %v570_v15 }
 0x1dc PF: > { %p14_p3 = scmp.ge.s32.totalorder %s983_s17, 10   ;;  %s1220_s12 = smov %s928_s13 }
 0x1dd   : > { %s1221_s13 = smov %s932_s14  ;;  %s1222_s14 = smov %s993_s20 }
 0x1de   : > { %s1223_s15 = smov %s983_s17  ;;  %16 = sbr.rel (!%p14_p3) target bundleno = 4 (0x4), region = 82 }
 0x1e3   :  { %604 = vsyncpa [#allocation3], 1 }
 0x1e4   :  { %606 = vsyncpa [#allocation3 + $0x1], 1 }
 0x1e5   :  { %607 = vsyncpa [#allocation5], 1 }

</bundles_post_ra>
